<compile_context>
chip_gen: v7x
topology: tpu7x:2x2x1
jax: 0.10.0
libtpu: 0.0.40
codegen_flags: <defaults>
</compile_context>

<pallas_src>
import functools

import jax
import jax.numpy as jnp
from jax.experimental import pallas as pl
from jax.experimental.pallas import tpu as pltpu


# ----------------------------------------------------------------------------
# cfg.eval defaults (GeoTransformer 3DMatch), baked in deterministically.
# ----------------------------------------------------------------------------
CFG = dict(
    acceptance_overlap=0.0,
    acceptance_radius=0.1,
    acceptance_rmse=0.2,
)


def _round_up(x, m):
    return ((x + m - 1) // m) * m


# ----------------------------------------------------------------------------
# Kernel 1: coarse precision (PIR)
#   hit_i = any_j (pred_key_i == gt_key_j) ;  PIR = sum(hit) / P
#   pred pad key = -1, gt pad / overlap-filtered key = -2  =>  pads never match.
# ----------------------------------------------------------------------------
def _pir_kernel(pred_ref, gt_ref, out_ref, acc_hit, *, tp, gt_chunk, n_chunks, inv_p):
    # pred_ref : (1, TP)     int32 tile of packed predicted keys (pads = -1)
    # gt_ref   : (G_pad, 1)  int32 packed gt keys, resident       (pads = -2)
    i = pl.program_id(0)

    @pl.when(i == 0)
    def _():
        acc_hit[...] = jnp.zeros_like(acc_hit)

    pk = pred_ref[...]                                     # (1, TP) int32

    if n_chunks == 1:
        g = gt_ref[...]                                    # (gt_chunk, 1)
        hit = jnp.max((g == pk).astype(jnp.float32), axis=0, keepdims=True)
    else:
        def body(c, h):
            start = pl.multiple_of(c * gt_chunk, gt_chunk)
            g = gt_ref[pl.ds(start, gt_chunk), :]          # (gt_chunk, 1)
            m = jnp.max((g == pk).astype(jnp.float32), axis=0, keepdims=True)
            return jnp.maximum(h, m)
        hit = jax.lax.fori_loop(0, n_chunks, body,
                                jnp.zeros((1, tp), jnp.float32))

    acc_hit[...] += jnp.sum(hit, keepdims=True)

    @pl.when(i == pl.num_programs(0) - 1)
    def _():
        out_ref[...] = acc_hit[...] * inv_p


def coarse_precision(ref_node_corr_indices, src_node_corr_indices,
                     gt_node_corr_indices, gt_node_corr_overlaps,
                     acceptance_overlap):
    P = int(ref_node_corr_indices.shape[0])
    G = int(gt_node_corr_indices.shape[0])

    TP = min(512, _round_up(max(P, 1), 128))     # tile over predicted pairs
    P_pad = _round_up(max(P, 1), TP)
    GT_CHUNK = 64                                # keeps (chunk x TP) <= 32K elems
    G_pad = _round_up(max(G, 1), GT_CHUNK)
    n_chunks = G_pad // GT_CHUNK

    # TODO(synk): key packing assumes coarse node indices < 32768 (true for
    # 3DMatch superpoint counts); widen the shift / use int64 keys otherwise.
    pred_keys = (ref_node_corr_indices.astype(jnp.int32) * 65536
                 + src_node_corr_indices.astype(jnp.int32))[None, :]        # (1, P)
    pred_keys = jnp.pad(pred_keys, ((0, 0), (0, P_pad - P)), constant_values=-1)

    gt_keys = (gt_node_corr_indices[:, 0].astype(jnp.int32) * 65536
               + gt_node_corr_indices[:, 1].astype(jnp.int32))               # (G,)
    gt_keys = jnp.where(gt_node_corr_overlaps.astype(jnp.float32)
                        > acceptance_overlap, gt_keys, -2)
    gt_keys = jnp.pad(gt_keys, (0, G_pad - G), constant_values=-2)[:, None]  # (G_pad, 1)

    kernel = functools.partial(_pir_kernel, tp=TP, gt_chunk=GT_CHUNK,
                               n_chunks=n_chunks, inv_p=1.0 / max(P, 1))
    out = pl.pallas_call(
        kernel,
        out_shape=jax.ShapeDtypeStruct((1, 1), jnp.float32),
        grid=(P_pad // TP,),
        in_specs=[pl.BlockSpec((1, TP), lambda i: (0, i)),
                  pl.BlockSpec((G_pad, 1), lambda i: (0, 0))],   # resident gt
        out_specs=pl.BlockSpec((1, 1), lambda i: (0, 0)),
        scratch_shapes=[pltpu.VMEM((1, 1), jnp.float32)],
        compiler_params=pltpu.CompilerParams(
            dimension_semantics=("arbitrary",),
            vmem_limit_bytes=2 * 1024 * 1024),
    )(pred_keys, gt_keys)
    return out[0, 0]


# ----------------------------------------------------------------------------
# Kernel 2: fused point metrics (IR + registration mean distance) in ONE call.
#   Grid axis = [seg0 tiles (IR) | seg1 tiles (RMSE)], segment boundary static.
#   seg0: d^2 = ||R*a + t - b||^2, accumulate [d^2 < r^2]          (a=src_corr, b=ref_corr)
#   seg1: d   = ||(R-I)*a + t||,   accumulate d                    (a=src_points, b unused)
#   Output (2, 2):  row0 = [_, IR ratio],  row1 = [mean dist, _].
# ----------------------------------------------------------------------------
def _fused_point_kernel(rt_ref, a_ref, b_ref, out_ref, acc_d, acc_in, *,
                        tn, n_tiles0, n_total, n0, n1, r0_sq, inv_n0, inv_n1):
    # rt_ref : SMEM (2, 12) f32 row-major [R | t] per segment
    # a_ref  : (3, TN) f32 coordinate-first point tile
    # b_ref  : (3, TN) f32 (only meaningful on segment 0; zeroed via use_b on seg 1)
    i = pl.program_id(0)
    is_rmse = i >= n_tiles0                       # segment flag (traced bool)

    @pl.when(jnp.logical_or(i == 0, i == n_tiles0))
    def _():
        acc_d[...] = jnp.zeros_like(acc_d)
        acc_in[...] = jnp.zeros_like(acc_in)

    seg = is_rmse.astype(jnp.int32)
    r00 = rt_ref[seg, 0]; r01 = rt_ref[seg, 1]; r02 = rt_ref[seg, 2]; t0 = rt_ref[seg, 3]
    r10 = rt_ref[seg, 4]; r11 = rt_ref[seg, 5]; r12 = rt_ref[seg, 6]; t1 = rt_ref[seg, 7]
    r20 = rt_ref[seg, 8]; r21 = rt_ref[seg, 9]; r22 = rt_ref[seg, 10]; t2 = rt_ref[seg, 11]

    a = a_ref[...]                                # (3, TN)
    use_b = jnp.where(is_rmse, 0.0, 1.0).astype(jnp.float32)
    b = b_ref[...] * use_b                        # (3, TN); contributes nothing on seg 1

    ax = a[0:1, :]; ay = a[1:2, :]; az = a[2:3, :]
    dx = r00 * ax + r01 * ay + r02 * az + t0 - b[0:1, :]
    dy = r10 * ax + r11 * ay + r12 * az + t1 - b[1:2, :]
    dz = r20 * ax + r21 * ay + r22 * az + t2 - b[2:3, :]
    d2 = dx * dx + dy * dy + dz * dz              # (1, TN)

    # validity mask computed in-kernel (no mask stream over HBM)
    seg_col0 = jnp.where(is_rmse, n_tiles0 * tn, 0)
    col = jax.lax.broadcasted_iota(jnp.int32, (1, tn), 1) + i * tn - seg_col0
    n_valid = jnp.where(is_rmse, n1, n0)
    m = (col < n_valid).astype(jnp.float32)       # (1, TN)

    @pl.when(jnp.logical_not(is_rmse))            # IR segment: inliers only (no sqrt)
    def _():
        inl = jnp.where(d2 < r0_sq, 1.0, 0.0)
        acc_in[...] += jnp.sum(inl * m, keepdims=True)

    @pl.when(is_rmse)                             # RMSE segment: mean distance only
    def _():
        acc_d[...] += jnp.sum(jnp.sqrt(d2) * m, keepdims=True)

    @pl.when(i == n_tiles0 - 1)                   # finalize segment 0
    def _():
        out_ref[0:1, 0:1] = acc_d[...] * inv_n0
        out_ref[0:1, 1:2] = acc_in[...] * inv_n0

    @pl.when(i == n_total - 1)                    # finalize segment 1
    def _():
        out_ref[1:2, 0:1] = acc_d[...] * inv_n1
        out_ref[1:2, 1:2] = acc_in[...] * inv_n1


def fused_point_metrics(src_corr_points, ref_corr_points, src_points,
                        rt_ir_3x4, rt_rmse_3x4, radius_ir):
    """Returns (IR inlier ratio, mean ||realign(src) - src||) from one pallas_call."""
    n0 = int(src_corr_points.shape[0])
    n1 = int(src_points.shape[0])

    TN = min(8192, _round_up(max(n0, n1, 1), 128))   # single step per segment when small
    n0_pad = _round_up(max(n0, 1), TN)
    n1_pad = _round_up(max(n1, 1), TN)
    n_tiles0 = n0_pad // TN
    n_tiles1 = n1_pad // TN
    n_total = n_tiles0 + n_tiles1

    def _prep(p, n_pad):
        cf = jnp.transpose(p.astype(jnp.float32))          # (3, n) coordinate-first
        return jnp.pad(cf, ((0, 0), (0, n_pad - p.shape[0])))

    a = jnp.concatenate([_prep(src_corr_points, n0_pad),
                         _prep(src_points, n1_pad)], axis=1)       # (3, n0_pad + n1_pad)
    b = _prep(ref_corr_points, n0_pad)                             # (3, n0_pad)
    rt = jnp.stack([jnp.reshape(rt_ir_3x4.astype(jnp.float32), (12,)),
                    jnp.reshape(rt_rmse_3x4.astype(jnp.float32), (12,))], axis=0)  # (2, 12)

    kernel = functools.partial(
        _fused_point_kernel, tn=TN, n_tiles0=n_tiles0, n_total=n_total,
        n0=n0, n1=n1, r0_sq=float(radius_ir) ** 2,
        inv_n0=1.0 / max(n0, 1), inv_n1=1.0 / max(n1, 1))

    # footprint-sized VMEM limit (a + b streams, double-buffered) with headroom
    tile_bytes = 2 * 2 * (3 * TN * 4)
    vmem_limit = int(max(4 * 1024 * 1024, 4 * tile_bytes))

    out = pl.pallas_call(
        kernel,
        out_shape=jax.ShapeDtypeStruct((2, 2), jnp.float32),
        grid=(n_total,),
        in_specs=[pl.BlockSpec(memory_space=pltpu.MemorySpace.SMEM),        # rt (2,12)
                  pl.BlockSpec((3, TN), lambda i: (0, i)),                  # a
                  # b only exists for segment 0; clamp its block index so the RMSE
                  # segment never triggers a fresh DMA (same index -> no refetch).
                  pl.BlockSpec((3, TN), lambda i: (0, jnp.minimum(i, n_tiles0 - 1)))],
        out_specs=pl.BlockSpec((2, 2), lambda i: (0, 0)),
        scratch_shapes=[pltpu.VMEM((1, 1), jnp.float32),
                        pltpu.VMEM((1, 1), jnp.float32)],
        compiler_params=pltpu.CompilerParams(
            dimension_semantics=("arbitrary",),
            vmem_limit_bytes=vmem_limit),
    )(rt, a, b)
    return out[0, 1], out[1, 0]        # (IR inlier ratio, registration mean distance)


# ----------------------------------------------------------------------------
# Plain-JAX glue (3x3 / 4x4 math; too small to be worth a pallas_call)
# ----------------------------------------------------------------------------
def apply_transform(points, transform):
    R = transform[:3, :3]
    t = transform[:3, 3]
    return points @ R.T + t


def isotropic_transform_error(gt_transform, est_transform):
    gt_R, gt_t = gt_transform[:3, :3], gt_transform[:3, 3]
    est_R, est_t = est_transform[:3, :3], est_transform[:3, 3]
    trace = jnp.trace(jnp.matmul(est_R.T, gt_R))
    x = jnp.clip(0.5 * (trace - 1.0), -1.0, 1.0)
    rre = jnp.rad2deg(jnp.arccos(x))
    rte = jnp.linalg.norm(gt_t - est_t)
    return rre, rte


def se3_inverse(transform):
    # TODO(synk): original uses torch.inverse on the 4x4; the analytic SE(3) inverse
    # is equivalent for rigid transforms and avoids a linear solve.
    R = transform[:3, :3]
    t = transform[:3, 3]
    Rinv = R.T
    tinv = -Rinv @ t
    return (jnp.eye(4, dtype=transform.dtype)
            .at[:3, :3].set(Rinv).at[:3, 3].set(tinv))


# ----------------------------------------------------------------------------
# Evaluator.forward
# ----------------------------------------------------------------------------
def evaluator_forward(output_dict, data_dict):
    transform = data_dict['transform'].astype(jnp.float32)

    # ----- evaluate_coarse (PIR) -----
    c_precision = coarse_precision(
        output_dict['ref_node_corr_indices'],
        output_dict['src_node_corr_indices'],
        output_dict['gt_node_corr_indices'],
        output_dict['gt_node_corr_overlaps'],
        CFG['acceptance_overlap'])

    # ----- evaluate_registration transforms (plain JAX) -----
    est_transform = output_dict['estimated_transform'].astype(jnp.float32)
    rre, rte = isotropic_transform_error(transform, est_transform)
    realignment = jnp.matmul(se3_inverse(transform), est_transform)
    # fold the identity: ||realign(p) - p|| == ||(R-I) p + t||, so src_points is read once
    rt_rmse = realignment[:3, :4].at[:, :3].add(-jnp.eye(3, dtype=jnp.float32))

    # ----- evaluate_fine (IR) + registration RMSE in one fused pallas_call -----
    f_precision, rmse = fused_point_metrics(
        output_dict['src_corr_points'],       # transformed by gt T inside the kernel
        output_dict['ref_corr_points'],
        output_dict['src_points'],
        transform[:3, :4],
        rt_rmse,
        CFG['acceptance_radius'])
    recall = (rmse < CFG['acceptance_rmse']).astype(jnp.float32)

    return {'PIR': c_precision, 'IR': f_precision,
            'RRE': rre, 'RTE': rte, 'RMSE': rmse, 'RR': recall}


# ----------------------------------------------------------------------------
# Example
# ----------------------------------------------------------------------------
def _rotation_matrix(axis, angle):
    axis = jnp.asarray(axis, jnp.float32)
    axis = axis / jnp.linalg.norm(axis)
    K = jnp.array([[0.0, -axis[2], axis[1]],
                   [axis[2], 0.0, -axis[0]],
                   [-axis[1], axis[0], 0.0]], jnp.float32)
    return (jnp.eye(3, dtype=jnp.float32) + jnp.sin(angle) * K
            + (1.0 - jnp.cos(angle)) * (K @ K))


if __name__ == "__main__":
    key = jax.random.PRNGKey(0)
    keys = jax.random.split(key, 8)

    # shapes (small example)
    N_ref_c, N_src_c = 32, 24        # coarse node counts
    G = 10                           # gt node correspondences
    P = 16                           # predicted node correspondences
    N_corr = 48                      # fine correspondence points
    N_src = 64                       # full src point cloud

    ref_points_c = jax.random.uniform(keys[0], (N_ref_c, 3), jnp.float32)
    src_points_c = jax.random.uniform(keys[1], (N_src_c, 3), jnp.float32)

    # ground-truth node correspondences + overlaps
    gt_ref_idx = (jnp.arange(G, dtype=jnp.int32) * 3) % N_ref_c
    gt_src_idx = (jnp.arange(G, dtype=jnp.int32) * 2 + 1) % N_src_c
    gt_node_corr_indices = jnp.stack([gt_ref_idx, gt_src_idx], axis=1)
    gt_node_corr_overlaps = jax.random.uniform(keys[2], (G,), jnp.float32,
                                               minval=0.05, maxval=0.9)

    # predicted node correspondences (half overlap the gt set)
    half = P // 2
    pred_ref_idx = jnp.concatenate(
        [gt_ref_idx[:half],
         (jnp.arange(P - half, dtype=jnp.int32) * 5 + 2) % N_ref_c])
    pred_src_idx = jnp.concatenate(
        [gt_src_idx[:half],
         (jnp.arange(P - half, dtype=jnp.int32) * 7 + 3) % N_src_c])

    # ground-truth SE(3) transform
    R_gt = _rotation_matrix(jnp.array([0.3, -0.5, 0.8]), 0.7)
    t_gt = jnp.array([0.1, -0.2, 0.05], jnp.float32)
    transform = (jnp.eye(4, dtype=jnp.float32)
                 .at[:3, :3].set(R_gt).at[:3, 3].set(t_gt))

    # estimated transform = gt composed with a small perturbation
    R_d = _rotation_matrix(jnp.array([0.0, 0.0, 1.0]), 0.03)
    t_d = jnp.array([0.01, -0.015, 0.02], jnp.float32)
    delta = (jnp.eye(4, dtype=jnp.float32)
             .at[:3, :3].set(R_d).at[:3, 3].set(t_d))
    estimated_transform = jnp.matmul(transform, delta)

    # fine correspondences: ref ~ T(src) + small noise so some inliers exist
    src_corr_points = jax.random.uniform(keys[3], (N_corr, 3), jnp.float32)
    noise = 0.05 * jax.random.normal(keys[4], (N_corr, 3), jnp.float32)
    ref_corr_points = apply_transform(src_corr_points, transform) + noise

    # full src point cloud for registration RMSE
    src_points = jax.random.uniform(keys[5], (N_src, 3), jnp.float32)

    output_dict = {
        'ref_points_c': ref_points_c,
        'src_points_c': src_points_c,
        'gt_node_corr_indices': gt_node_corr_indices,
        'gt_node_corr_overlaps': gt_node_corr_overlaps,
        'ref_node_corr_indices': pred_ref_idx,
        'src_node_corr_indices': pred_src_idx,
        'ref_corr_points': ref_corr_points,
        'src_corr_points': src_corr_points,
        'estimated_transform': estimated_transform,
        'src_points': src_points,
    }
    data_dict = {'transform': transform}

    results = evaluator_forward(output_dict, data_dict)
    results = jax.tree_util.tree_map(jax.block_until_ready, results)
    print("KERNEL_OK")
</pallas_src>

<mosaic_0001>
module attributes {stable_mosaic.version = 11 : i64} {
  func.func @_pir_kernel(%arg0: i32, %arg1: memref<1x128xi32, #tpu.memory_space<vmem>>, %arg2: memref<64x1xi32, #tpu.memory_space<vmem>>, %arg3: memref<1x1xf32, #tpu.memory_space<vmem>>, %arg4: memref<1x1xf32, #tpu.memory_space<vmem>>) attributes {dimension_semantics = [#tpu.dimension_semantics<arbitrary>], iteration_bounds = array<i64: 1>, scalar_prefetch = 0 : i64, scratch_operands = 1 : i64, tpu.core_type = #tpu.core_type<tc>, window_params = [{transform_indices = @transform_0, window_bounds = array<i64: 1, 128>}, {pipeline_mode = #tpu.pipeline_mode<synchronous>, transform_indices = @transform_1, window_bounds = array<i64: 64, 1>}, {pipeline_mode = #tpu.pipeline_mode<synchronous>, transform_indices = @transform_2, window_bounds = array<i64: 1, 1>}]} {
    %c0_i32 = arith.constant 0 : i32
    %0 = arith.cmpi eq, %arg0, %c0_i32 : i32
    %1 = arith.extui %0 : i1 to i32
    %c0_i32_0 = arith.constant 0 : i32
    %2 = arith.cmpi ne, %1, %c0_i32_0 : i32
    scf.if %2 {
      %cst_11 = arith.constant 0.000000e+00 : f32
      %23 = vector.broadcast %cst_11 : f32 to vector<1x1xf32>
      %c0_12 = arith.constant 0 : index
      %c0_13 = arith.constant 0 : index
      %24 = vector.load %arg4[%c0_12, %c0_13] : memref<1x1xf32, #tpu.memory_space<vmem>>, vector<1x1xf32>
      tpu.vector_store %arg4[%c0_12, %c0_13], %23 {strides = array<i32>} : memref<1x1xf32, #tpu.memory_space<vmem>>, vector<1x1xf32>,
    } else {
    }
    %c0 = arith.constant 0 : index
    %c0_1 = arith.constant 0 : index
    %3 = vector.load %arg1[%c0, %c0_1] : memref<1x128xi32, #tpu.memory_space<vmem>>, vector<1x128xi32>
    %c0_2 = arith.constant 0 : index
    %c0_3 = arith.constant 0 : index
    %4 = vector.load %arg2[%c0_2, %c0_3] : memref<64x1xi32, #tpu.memory_space<vmem>>, vector<64x1xi32>
    %5 = vector.broadcast %4 : vector<64x1xi32> to vector<64x128xi32>
    %6 = vector.broadcast %3 : vector<1x128xi32> to vector<64x128xi32>
    %7 = arith.cmpi eq, %5, %6 : vector<64x128xi32>
    %8 = arith.extui %7 : vector<64x128xi1> to vector<64x128xi32>
    %9 = arith.sitofp %8 : vector<64x128xi32> to vector<64x128xf32>
    %cst = arith.constant dense<0xFF800000> : vector<128xf32>
    %10 = vector.multi_reduction <maximumf>, %9, %cst [0] : vector<64x128xf32> to vector<128xf32>
    %11 = vector.shape_cast %10 : vector<128xf32> to vector<1x128xf32>
    %c0_4 = arith.constant 0 : index
    %c0_5 = arith.constant 0 : index
    %12 = vector.load %arg4[%c0_4, %c0_5] : memref<1x1xf32, #tpu.memory_space<vmem>>, vector<1x1xf32>
    %13 = vector.shape_cast %11 : vector<1x128xf32> to vector<1x1x128xf32>
    %cst_6 = arith.constant dense<0.000000e+00> : vector<1xf32>
    %14 = vector.multi_reduction <add>, %13, %cst_6 [1, 2] : vector<1x1x128xf32> to vector<1xf32>
    %15 = vector.shape_cast %14 : vector<1xf32> to vector<1x1x1xf32>
    %16 = vector.extract %15[0, 0, 0] : f32 from vector<1x1x1xf32>
    %17 = vector.broadcast %16 : f32 to vector<1x1xf32>
    %18 = arith.addf %12, %17 : vector<1x1xf32>
    %c0_7 = arith.constant 0 : index
    %c0_8 = arith.constant 0 : index
    %19 = vector.load %arg4[%c0_7, %c0_8] : memref<1x1xf32, #tpu.memory_space<vmem>>, vector<1x1xf32>
    tpu.vector_store %arg4[%c0_7, %c0_8], %18 {strides = array<i32>} : memref<1x1xf32, #tpu.memory_space<vmem>>, vector<1x1xf32>,
    %c0_i32_9 = arith.constant 0 : i32
    %20 = arith.cmpi eq, %arg0, %c0_i32_9 : i32
    %21 = arith.extui %20 : i1 to i32
    %c0_i32_10 = arith.constant 0 : i32
    %22 = arith.cmpi ne, %21, %c0_i32_10 : i32
    scf.if %22 {
      %c0_11 = arith.constant 0 : index
      %c0_12 = arith.constant 0 : index
      %23 = vector.load %arg4[%c0_11, %c0_12] : memref<1x1xf32, #tpu.memory_space<vmem>>, vector<1x1xf32>
      %cst_13 = arith.constant 6.250000e-02 : f32
      %24 = vector.broadcast %cst_13 : f32 to vector<1x1xf32>
      %25 = arith.mulf %23, %24 : vector<1x1xf32>
      %c0_14 = arith.constant 0 : index
      %c0_15 = arith.constant 0 : index
      %26 = vector.load %arg3[%c0_14, %c0_15] : memref<1x1xf32, #tpu.memory_space<vmem>>, vector<1x1xf32>
      tpu.vector_store %arg3[%c0_14, %c0_15], %25 {strides = array<i32>} : memref<1x1xf32, #tpu.memory_space<vmem>>, vector<1x1xf32>,
    } else {
    }
    return
  }
  func.func @transform_0(%arg0: i32) -> (i32, i32) {
    %c0_i32 = arith.constant 0 : i32
    %c0_i32_0 = arith.constant 0 : i32
    return %c0_i32, %arg0 : i32, i32
  }
  func.func @transform_1(%arg0: i32) -> (i32, i32) {
    %c0_i32 = arith.constant 0 : i32
    %c0_i32_0 = arith.constant 0 : i32
    %c0_i32_1 = arith.constant 0 : i32
    return %c0_i32, %c0_i32_0 : i32, i32
  }
  func.func @transform_2(%arg0: i32) -> (i32, i32) {
    %c0_i32 = arith.constant 0 : i32
    %c0_i32_0 = arith.constant 0 : i32
    %c0_i32_1 = arith.constant 0 : i32
    return %c0_i32, %c0_i32_0 : i32, i32
  }
}

</mosaic_0001>

<bundles_post_ra>
// kernel: tpu_custom_call.1
= control target key start
LH: loop header
LB: loop body
LE: loop exit
PB: predicated region body
PF: predicated region fallthrough
CT: control target
= control target key end

     0   :  { %v168_v2 = vmov 0   ;;  %s228_s0 = inlined_call_operand.vmem [shape: s32[1,128], index: 0, kind: input, shape index: {}]   ;;  %s229_s1 = inlined_call_operand.vmem [shape: s32[64,1], index: 1, kind: input, shape index: {}]   ;;  %s230_s2 = inlined_call_operand.hbm [shape: f32[1,1], index: 2, kind: output, shape index: {}]  }
   0x1   :  { %v21_v0 = vld [vmem:[%s229_s1 + $0x10] sm:$0xff]  ;;  %v19_v1 = vld [vmem:[%s229_s1] sm:$0xff]  ;;  %143 = vset.pattern.permute.xlu1 %v168_v2  ;;  %142 = vset.pattern.permute.xlu0 %v168_v2  ;;  %v22_v3 = vld [vmem:[%s229_s1 + $0x18] sm:$0xff] }
   0x2   :  { %34 = vperm.xlu1 %143, %v21_v0   ;;  %28 = vperm.xlu0 %142, %v19_v1   ;;  %v20_v4 = vld [vmem:[%s229_s1 + $0x8] sm:$0xff] }
   0x3   :  { %7 = vsyncpa [#allocation4], 0  ;;  %v24_v5 = vld [vmem:[%s229_s1 + $0x28] sm:$0xff]  ;;  %v23_v6 = vld [vmem:[%s229_s1 + $0x20] sm:$0xff]  ;;  %v169_v16 = vmov 0.0   ;;  %vm93_vm8 = vcmask 1040384  }
   0x4   :  { %v26_v7 = vld [vmem:[%s229_s1 + $0x38] sm:$0xff]  ;;  %v25_v8 = vld [vmem:[%s229_s1 + $0x30] sm:$0xff]  ;;  %v128_v13 = vld [vmem:[%s228_s0] ss:$0 sm:$0xff]  ;;  %vm16_vm9 = vcmask 0   ;;  %s170_s1 = smov [#allocation3]  }
   0x5   :  { %17 = vst.msk [vmem:[#allocation2] sm:$0x1] %vm16_vm9, %v169_v16  ;;  %s120_s27 = sshll.u32 %s170_s1, 4  ;;  %s121_s27 = int_to_ptr.vmem [resolvable:$true] %s120_s27 }
   0x6   :  { %37 = vperm.xlu1 %143, %v22_v3   ;;  %31 = vperm.xlu0 %142, %v20_v4   ;;  %s144_s28 = scalar_lea.vmem %s121_s27, 16  ;;  %s148_s29 = scalar_lea.vmem %s121_s27, 32 }
   0x7   :  { %p145_p0 = scmp.ne.s32.totalorder %s121_s27, %s144_s28  ;;  %p149_p1 = scmp.lt.s32.totalorder %s121_s27, %s121_s27 }
   0x8   :  { %p150_p2 = scmp.lt.s32.totalorder %s148_s29, %s144_s28 }
   0xa   :  { %43 = vperm.xlu1 %143, %v24_v5   ;;  %40 = vperm.xlu0 %142, %v23_v6   ;;  %p151_p3 = por %p150_p2, %p149_p1 }
   0xc   :  { %v92_v48 = vld [vmem:[#allocation2] sm:$0x1]  ;;  %p152_p4 = pnand %p151_p3, %p145_p0 }
   0xe   :  { %49 = vperm.xlu1 %143, %v26_v7   ;;  %46 = vperm.xlu0 %142, %v25_v8  }
  0x81   :  { %v35_v9 = vpop.permute.xlu1 %34  ;;  %v29_v10 = vpop.permute.xlu0 %28 }
  0x82   :  { %vm55_vm0 = vcmp.eq.s32.totalorder %v29_v10, %v128_v13  ;;  %vm57_vm4 = vcmp.eq.s32.totalorder %v35_v9, %v128_v13 }
  0x83   :  { %v129_v19 = vsel %vm55_vm0, 1.0, %v169_v16  ;;  %v131_v25 = vsel %vm57_vm4, 1.0, %v169_v16 }
  0x85   :  { %v38_v11 = vpop.permute.xlu1 %37  ;;  %v32_v12 = vpop.permute.xlu0 %31 }
  0x86   :  { %vm56_vm1 = vcmp.eq.s32.totalorder %v32_v12, %v128_v13  ;;  %vm58_vm5 = vcmp.eq.s32.totalorder %v38_v11, %v128_v13 }
  0x87   :  { %v130_v20 = vsel %vm56_vm1, 1.0, %v169_v16  ;;  %v132_v26 = vsel %vm58_vm5, 1.0, %v169_v16 }
  0x89   :  { %v44_v14 = vpop.permute.xlu1 %43  ;;  %v41_v15 = vpop.permute.xlu0 %40 }
  0x8a   :  { %vm60_vm2 = vcmp.eq.s32.totalorder %v44_v14, %v128_v13  ;;  %vm59_vm3 = vcmp.eq.s32.totalorder %v41_v15, %v128_v13 }
  0x8b   :  { %v134_v17 = vsel %vm60_vm2, 1.0, %v169_v16  ;;  %v133_v18 = vsel %vm59_vm3, 1.0, %v169_v16 }
  0x8c   :  { %v80_v23 = vmax.f32 %v130_v20, %v134_v17  ;;  %v79_v24 = vmax.f32 %v129_v19, %v133_v18 }
  0x8d   :  { %v50_v21 = vpop.permute.xlu1 %49  ;;  %v47_v22 = vpop.permute.xlu0 %46 }
  0x8e   :  { %vm62_vm6 = vcmp.eq.s32.totalorder %v50_v21, %v128_v13  ;;  %vm61_vm7 = vcmp.eq.s32.totalorder %v47_v22, %v128_v13  ;;  %v83_v31 = vmax.f32 %v79_v24, %v80_v23 }
  0x8f   :  { %v136_v27 = vsel %vm62_vm6, 1.0, %v169_v16  ;;  %v135_v28 = vsel %vm61_vm7, 1.0, %v169_v16 }
  0x90   :  { %v82_v29 = vmax.f32 %v132_v26, %v136_v27  ;;  %v81_v30 = vmax.f32 %v131_v25, %v135_v28 }
  0x92   :  { %v84_v32 = vmax.f32 %v81_v30, %v82_v29 }
  0x94   :  { %v85_v33 = vmax.f32 %v83_v31, %v84_v32 }
  0x96   :  { %v86_v34 = vrot.slane %v85_v33, 4 }
  0x98   :  { %v87_v35 = vmax.f32 %v85_v33, %v86_v34 }
  0x9a   :  { %v88_v36 = vrot.slane %v87_v35, 2 }
  0x9c   :  { %v89_v37 = vmax.f32 %v87_v35, %v88_v36 }
  0x9e   :  { %v90_v38 = vrot.slane %v89_v37, 1 }
  0xa0   :  { %v91_v39 = vmax.f32 %v89_v37, %v90_v38 }
  0xa2   :  { %v94_v40 = vsel %vm93_vm8, %v91_v39, 0.0 }
  0xa3   :  { %95 = vadd.xlane.f32.xlu0 %v94_v40 }
 0x130   :  { %v96_v41 = vpop.xlane.xlu0 %95 }
 0x131   :  { %v97_v42 = vrot.slane %v96_v41, 4 }
 0x133   :  { %v98_v43 = vadd.f32 %v97_v42, %v96_v41 }
 0x135   :  { %v99_v44 = vrot.slane %v98_v43, 2 }
 0x137   :  { %v100_v45 = vadd.f32 %v99_v44, %v98_v43 }
 0x139   :  { %v101_v46 = vrot.slane %v100_v45, 1 }
 0x13b   :  { %v102_v47 = vadd.f32 %v101_v46, %v100_v45 }
 0x13d   :  { %137 = vpush %v102_v47 }
 0x16e   :  { %s138_s0 = spop %137 }
 0x16f   :  { %v104_v49 = vstv %s138_s0 }
 0x170   :  { %v105_v50 = vadd.f32 %v104_v49, %v92_v48 }
 0x172   :  { %107 = vst.msk [vmem:[#allocation2] sm:$0x1] %vm16_vm9, %v105_v50 }
 0x179   :  { %v111_v51 = vld [vmem:[#allocation2] sm:$0x1] }
 0x17a   :  { %v112_v52 = vmul.f32 0.0625, %v111_v51 }
 0x17c   :  { %113 = vst.msk [vmem:[#allocation3] sm:$0x1] %vm16_vm9, %v112_v52 }
 0x17d   :  { %155 = shalt.err (!%p152_p4)
}
 0x17e   :  { %s156_s4 = scalar_lea.hbm %s230_s2, 16 }
 0x17f   :  { %p157_p5 = scmp.ne.s32.totalorder %s230_s2, %s156_s4  ;;  %p160_p6 = scmp.lt.u32.totalorder %s156_s4, %s230_s2 }
 0x181   :  { %p162_p7 = pnand %p160_p6, %p157_p5 }
 0x183   :  { %165 = shalt.err (!%p162_p7)
}
 0x184   :  { %123 = dma.vmem_to_hbm [thread:$0]  %s121_s27, 16, %s230_s2, [#allocation4]  }
 0x185   :  { %166 = dma.done.wait [#allocation4], 16  }
 0x186   :  { %167 = vsyncadd [#allocation4], 4294967280 }
 0x187   :  { %127 = vsyncpa [#allocation4], 1 }

</bundles_post_ra>
